<compile_context>
chip_gen: v6e
topology: v6e:2x2x1
jax: 0.10.0
libtpu: 0.0.40
codegen_flags: <defaults>
</compile_context>

<pallas_src>
import functools

import jax
import jax.numpy as jnp
from jax import lax
from jax.experimental import pallas as pl
from jax.experimental.pallas import tpu as pltpu


# ----------------------------------------------------------------------------
# Pallas kernel: retimed 2-layer tanh RNN recurrence + output projection for
# one batch tile.  x block is (1, T, tb), per-tile time-major.
# ----------------------------------------------------------------------------
def rnn_scaler_kernel(
    x_ref,       # (1, T, tb)   input scores, per-tile time-major
    wih0p_ref,   # (1, 2H)      [W_ih0 | 0]
    wrec_ref,    # (2H, 2H)     W' = [[W_hh0^T, W_ih1^T], [0, W_hh1^T]]
    bfull_ref,   # (1, 2H)      [b0 | b1]
    woutp_ref,   # (1, 2H)      [0 | W_out]
    bout_ref,    # (1, 1)       output bias
    out_ref,     # (1, T, tb)   output logits, per-tile time-major
    stage_ref,   # (T, tb, 2H)  scratch: additive terms, then staged carries
    *,
    unroll,
):
    _, T, TB = x_ref.shape
    H2 = wrec_ref.shape[0]
    H = H2 // 2

    wrec = wrec_ref[...]
    wih0p = wih0p_ref[...]
    bfull = bfull_ref[...]

    # Fill pass: stage[t] = [x_t * W_ih0 + b0 | b1] for all t (lane-dense 2H).
    stage_ref[...] = (
        x_ref[0][:, :, None] * wih0p[None, :, :] + bfull[None, :, :]
    )

    # Prologue (t = 0): c(0) = [h0(0) | h1(-1)] = [tanh(x_0*W_ih0 + b0) | 0].
    lane = lax.broadcasted_iota(jnp.int32, (1, H2), 1)
    h0_mask = (lane < H).astype(jnp.float32)          # [1..1 | 0..0]
    c0 = jnp.tanh(stage_ref[0]) * h0_mask

    # Retimed recurrence: one MXU push + one tanh per step.
    #   c(t) = tanh(c(t-1) @ W' + stage[t]) = [h0(t) | h1(t-1)]
    # The already-consumed slot stage[t-1] is overwritten with c(t); its second
    # half is exactly h1(t-1), which the output projection reads afterwards.
    def step(t, c):
        add_t = stage_ref[t]
        c_new = jnp.tanh(
            jnp.dot(c, wrec, preferred_element_type=jnp.float32) + add_t
        )
        stage_ref[t - 1] = c_new
        return c_new

    c = lax.fori_loop(1, T, step, c0, unroll=unroll)

    # Epilogue: one more retimed step yields h1(T-1) in the second half; the
    # x-term only affects the (discarded) h0 half, so only the bias is added.
    stage_ref[T - 1] = jnp.tanh(
        jnp.dot(c, wrec, preferred_element_type=jnp.float32) + bfull
    )

    # Output projection off the MXU: VPU multiply + lane reduce over all steps
    # at once.  woutp = [0 | W_out] masks out the h0 / garbage halves.
    y = jnp.sum(stage_ref[...] * woutp_ref[...][None, :, :], axis=-1)  # (T, TB)
    out_ref[0] = y + bout_ref[...]


# ----------------------------------------------------------------------------
# Wrapper: parameter plumbing, batch padding / megacore-aware tiling.
# ----------------------------------------------------------------------------
def _multi_tensorcore():
    # Perf-only heuristic: chips with 2 TensorCores (v4, v5p, v7x) benefit from
    # splitting independent batch rows across cores; 1-TC chips do not.
    try:
        kind = jax.local_devices()[0].device_kind.lower()
    except Exception:
        return False
    return any(tag in kind for tag in ("v4", "v5p", "v7"))


def recurrent_scaler_forward(x, params):
    B, T = x.shape
    H = params["whh0"].shape[0]
    H2 = 2 * H
    f32 = jnp.float32

    # --- parameter plumbing: retimed block recurrent weight, folded biases ---
    whh0_t = params["whh0"].T.astype(f32)
    whh1_t = params["whh1"].T.astype(f32)
    wih1_t = params["wih1"].T.astype(f32)
    wrec = jnp.block(
        [[whh0_t, wih1_t],
         [jnp.zeros((H, H), f32), whh1_t]]
    )                                                            # (2H, 2H)
    wih0p = jnp.concatenate(
        [params["wih0"].reshape(1, H).astype(f32), jnp.zeros((1, H), f32)],
        axis=1,
    )                                                            # (1, 2H)
    b0 = (params["bih0"] + params["bhh0"]).reshape(1, H).astype(f32)
    b1 = (params["bih1"] + params["bhh1"]).reshape(1, H).astype(f32)
    bfull = jnp.concatenate([b0, b1], axis=1)                    # (1, 2H)
    woutp = jnp.concatenate(
        [jnp.zeros((1, H), f32), params["wout"].reshape(1, H).astype(f32)],
        axis=1,
    )                                                            # (1, 2H)
    bout = params["bout"].reshape(1, 1).astype(f32)              # (1, 1)

    # --- batch padding / tiling ---------------------------------------------
    def round_up(a, m):
        return (a + m - 1) // m * m

    b_pad = max(8, round_up(B, 8))
    if _multi_tensorcore() and b_pad >= 16:
        tb = min(256, round_up(pl.cdiv(b_pad, 2), 8))   # >= 2 parallel programs
    else:
        tb = min(256, b_pad)                            # single big tile (1 TC)
    b_pad = round_up(b_pad, tb)
    n_tiles = b_pad // tb

    # unroll tuned to the tile height (avoid vreg spills at tb >= 128).
    base = 2 if tb >= 128 else (4 if tb >= 64 else 8)
    unroll = max(1, min(T - 1, base))

    # Pad batch and lay out per-tile time-major: (n_tiles, T, tb).
    x_p = jnp.zeros((b_pad, T), f32).at[:B, :].set(x.astype(f32))
    x_tiles = jnp.transpose(x_p.reshape(n_tiles, tb, T), (0, 2, 1))

    stage_bytes = T * tb * H2 * 4
    vmem_limit = min(
        128 * 1024 * 1024,
        max(32 * 1024 * 1024, 2 * stage_bytes + (16 * 1024 * 1024)),
    )

    kernel = functools.partial(rnn_scaler_kernel, unroll=unroll)

    def full(shape):
        return pl.BlockSpec(shape, lambda b: (0,) * len(shape))

    out_tiles = pl.pallas_call(
        kernel,
        out_shape=jax.ShapeDtypeStruct((n_tiles, T, tb), f32),
        grid=(n_tiles,),
        in_specs=[
            pl.BlockSpec((1, T, tb), lambda b: (b, 0, 0)),  # x batch tile
            full((1, H2)),                                  # [W_ih0 | 0]
            full((H2, H2)),                                 # retimed W'
            full((1, H2)),                                  # [b0 | b1]
            full((1, H2)),                                  # [0 | W_out]
            full((1, 1)),                                   # b_out
        ],
        out_specs=pl.BlockSpec((1, T, tb), lambda b: (b, 0, 0)),
        scratch_shapes=[pltpu.VMEM((T, tb, H2), f32)],      # merged staging buf
        compiler_params=pltpu.CompilerParams(
            dimension_semantics=("parallel",),
            vmem_limit_bytes=vmem_limit,
        ),
    )(x_tiles, wih0p, wrec, bfull, woutp, bout)

    out = jnp.transpose(out_tiles, (0, 2, 1)).reshape(b_pad, T)
    return out[:B, :]


# ----------------------------------------------------------------------------
# Pure-JAX reference (mirrors torch.nn.RNN + nn.Linear) for verification.
# ----------------------------------------------------------------------------
def recurrent_scaler_reference(x, params):
    B, T = x.shape
    H = params["whh0"].shape[0]

    def step(carry, x_t):
        h0, h1 = carry
        pre0 = (
            x_t[:, None] * params["wih0"][:, 0][None, :]
            + h0 @ params["whh0"].T
            + params["bih0"][None, :]
            + params["bhh0"][None, :]
        )
        h0n = jnp.tanh(pre0)
        pre1 = (
            h0n @ params["wih1"].T
            + h1 @ params["whh1"].T
            + params["bih1"][None, :]
            + params["bhh1"][None, :]
        )
        h1n = jnp.tanh(pre1)
        y = h1n @ params["wout"].reshape(1, H).T + params["bout"]
        return (h0n, h1n), y[:, 0]

    init = (jnp.zeros((B, H), jnp.float32), jnp.zeros((B, H), jnp.float32))
    _, ys = lax.scan(step, init, jnp.transpose(x))            # ys: (T, B)
    return jnp.transpose(ys)                                  # (B, T)


def init_params(key, hidden_size=64):
    H = hidden_size
    bound = 1.0 / jnp.sqrt(H)  # PyTorch default uniform(-1/sqrt(H), 1/sqrt(H))
    ks = jax.random.split(key, 10)
    u = lambda k, shape: jax.random.uniform(
        k, shape, jnp.float32, minval=-bound, maxval=bound
    )
    return {
        "wih0": u(ks[0], (H, 1)),     # RNN layer 0 weight_ih_l0
        "whh0": u(ks[1], (H, H)),     # RNN layer 0 weight_hh_l0
        "bih0": u(ks[2], (H,)),
        "bhh0": u(ks[3], (H,)),
        "wih1": u(ks[4], (H, H)),     # RNN layer 1 weight_ih_l1
        "whh1": u(ks[5], (H, H)),     # RNN layer 1 weight_hh_l1
        "bih1": u(ks[6], (H,)),
        "bhh1": u(ks[7], (H,)),
        "wout": u(ks[8], (1, H)),     # hidden_to_output weight
        "bout": u(ks[9], (1,)),       # hidden_to_output bias
    }


if __name__ == "__main__":
    key = jax.random.PRNGKey(0)
    k_x, k_p = jax.random.split(key)

    B, T, H = 2, 8, 64  # batch, seq, hidden (module default hidden_size=64)
    x = jax.random.uniform(k_x, (B, T), jnp.float32)  # sequential scores
    params = init_params(k_p, hidden_size=H)

    out = jax.block_until_ready(recurrent_scaler_forward(x, params))
    ref = jax.block_until_ready(recurrent_scaler_reference(x, params))

    assert out.shape == (B, T)
    # TPU EUP tanh / reduce-order differences: slightly looser than 1e-5.
    assert jnp.allclose(out, ref, atol=1e-4, rtol=1e-4), (out, ref)

    print("KERNEL_OK")
</pallas_src>

<mosaic_0001>
module attributes {stable_mosaic.version = 11 : i64} {
  func.func @rnn_scaler_kernel(%arg0: i32, %arg1: memref<1x8x8xf32, #tpu.memory_space<vmem>>, %arg2: memref<1x128xf32, #tpu.memory_space<vmem>>, %arg3: memref<128x128xf32, #tpu.memory_space<vmem>>, %arg4: memref<1x128xf32, #tpu.memory_space<vmem>>, %arg5: memref<1x128xf32, #tpu.memory_space<vmem>>, %arg6: memref<1x1xf32, #tpu.memory_space<vmem>>, %arg7: memref<1x8x8xf32, #tpu.memory_space<vmem>>, %arg8: memref<8x8x128xf32, #tpu.memory_space<vmem>>) attributes {dimension_semantics = [#tpu.dimension_semantics<parallel>], iteration_bounds = array<i64: 1>, scalar_prefetch = 0 : i64, scratch_operands = 1 : i64, tpu.core_type = #tpu.core_type<tc>, window_params = [{transform_indices = @transform_0, window_bounds = array<i64: 1, 8, 8>}, {pipeline_mode = #tpu.pipeline_mode<synchronous>, transform_indices = @transform_1, window_bounds = array<i64: 1, 128>}, {pipeline_mode = #tpu.pipeline_mode<synchronous>, transform_indices = @transform_2, window_bounds = array<i64: 128, 128>}, {pipeline_mode = #tpu.pipeline_mode<synchronous>, transform_indices = @transform_3, window_bounds = array<i64: 1, 128>}, {pipeline_mode = #tpu.pipeline_mode<synchronous>, transform_indices = @transform_4, window_bounds = array<i64: 1, 128>}, {pipeline_mode = #tpu.pipeline_mode<synchronous>, transform_indices = @transform_5, window_bounds = array<i64: 1, 1>}, {transform_indices = @transform_6, window_bounds = array<i64: 1, 8, 8>}]} {
    %c0 = arith.constant 0 : index
    %c0_0 = arith.constant 0 : index
    %0 = vector.load %arg3[%c0, %c0_0] : memref<128x128xf32, #tpu.memory_space<vmem>>, vector<128x128xf32>
    %c0_1 = arith.constant 0 : index
    %c0_2 = arith.constant 0 : index
    %1 = vector.load %arg2[%c0_1, %c0_2] : memref<1x128xf32, #tpu.memory_space<vmem>>, vector<1x128xf32>
    %c0_3 = arith.constant 0 : index
    %c0_4 = arith.constant 0 : index
    %2 = vector.load %arg4[%c0_3, %c0_4] : memref<1x128xf32, #tpu.memory_space<vmem>>, vector<1x128xf32>
    %c0_5 = arith.constant 0 : index
    %c0_6 = arith.constant 0 : index
    %c0_7 = arith.constant 0 : index
    %3 = vector.load %arg1[%c0_5, %c0_6, %c0_7] : memref<1x8x8xf32, #tpu.memory_space<vmem>>, vector<1x8x8xf32>
    %4 = vector.shape_cast %3 : vector<1x8x8xf32> to vector<8x8xf32>
    %5 = vector.shape_cast %4 : vector<8x8xf32> to vector<8x8x1xf32>
    %6 = vector.shape_cast %1 : vector<1x128xf32> to vector<1x1x128xf32>
    %7 = vector.broadcast %5 : vector<8x8x1xf32> to vector<8x8x128xf32>
    %8 = vector.broadcast %6 : vector<1x1x128xf32> to vector<8x8x128xf32>
    %9 = arith.mulf %7, %8 : vector<8x8x128xf32>
    %10 = vector.shape_cast %2 : vector<1x128xf32> to vector<1x1x128xf32>
    %11 = vector.broadcast %10 : vector<1x1x128xf32> to vector<8x8x128xf32>
    %12 = arith.addf %9, %11 : vector<8x8x128xf32>
    %c0_8 = arith.constant 0 : index
    %c0_9 = arith.constant 0 : index
    %c0_10 = arith.constant 0 : index
    %13 = vector.load %arg8[%c0_8, %c0_9, %c0_10] : memref<8x8x128xf32, #tpu.memory_space<vmem>>, vector<8x8x128xf32>
    tpu.vector_store %arg8[%c0_8, %c0_9, %c0_10], %12 {strides = array<i32>} : memref<8x8x128xf32, #tpu.memory_space<vmem>>, vector<8x8x128xf32>,
    %14 = tpu.iota {dimensions = array<i32: 1>} : vector<1x128xi32>
    %c64_i32 = arith.constant 64 : i32
    %15 = vector.broadcast %c64_i32 : i32 to vector<1x128xi32>
    %16 = arith.cmpi slt, %14, %15 : vector<1x128xi32>
    %17 = arith.extui %16 : vector<1x128xi1> to vector<1x128xi32>
    %18 = arith.sitofp %17 : vector<1x128xi32> to vector<1x128xf32>
    %c0_11 = arith.constant 0 : index
    %c0_12 = arith.constant 0 : index
    %c0_13 = arith.constant 0 : index
    %19 = vector.load %arg8[%c0_11, %c0_12, %c0_13] : memref<8x8x128xf32, #tpu.memory_space<vmem>>, vector<1x8x128xf32>
    %20 = vector.shape_cast %19 : vector<1x8x128xf32> to vector<8x128xf32>
    %21 = math.tanh %20 : vector<8x128xf32>
    %22 = vector.broadcast %18 : vector<1x128xf32> to vector<8x128xf32>
    %23 = arith.mulf %21, %22 : vector<8x128xf32>
    %c1_i32 = arith.constant 1 : i32
    %24 = arith.index_cast %c1_i32 : i32 to index
    %c0_14 = arith.constant 0 : index
    %c0_15 = arith.constant 0 : index
    %25 = vector.load %arg8[%24, %c0_14, %c0_15] : memref<8x8x128xf32, #tpu.memory_space<vmem>>, vector<1x8x128xf32>
    %26 = vector.shape_cast %25 : vector<1x8x128xf32> to vector<8x128xf32>
    %cst = arith.constant dense<0.000000e+00> : vector<8x128xf32>
    %27 = tpu.matmul %23, %0, %cst {dimension_numbers = #tpu.dot_dimension_numbers<[1], [0], [0], [1], [0, 0, 1, 1], [], []>} : vector<8x128xf32>, vector<128x128xf32>, vector<8x128xf32> -> vector<8x128xf32>
    %28 = arith.addf %27, %26 : vector<8x128xf32>
    %29 = math.tanh %28 : vector<8x128xf32>
    %c1_i32_16 = arith.constant 1 : i32
    %30 = arith.subi %c1_i32, %c1_i32_16 : i32
    %31 = arith.index_cast %30 : i32 to index
    %c0_17 = arith.constant 0 : index
    %c0_18 = arith.constant 0 : index
    %32 = vector.load %arg8[%31, %c0_17, %c0_18] : memref<8x8x128xf32, #tpu.memory_space<vmem>>, vector<1x8x128xf32>
    %33 = vector.shape_cast %32 : vector<1x8x128xf32> to vector<8x128xf32>
    %34 = vector.shape_cast %29 : vector<8x128xf32> to vector<1x8x128xf32>
    tpu.vector_store %arg8[%31, %c0_17, %c0_18], %34 {strides = array<i32>} : memref<8x8x128xf32, #tpu.memory_space<vmem>>, vector<1x8x128xf32>,
    %c2_i32 = arith.constant 2 : i32
    %35 = arith.index_cast %c2_i32 : i32 to index
    %c0_19 = arith.constant 0 : index
    %c0_20 = arith.constant 0 : index
    %36 = vector.load %arg8[%35, %c0_19, %c0_20] : memref<8x8x128xf32, #tpu.memory_space<vmem>>, vector<1x8x128xf32>
    %37 = vector.shape_cast %36 : vector<1x8x128xf32> to vector<8x128xf32>
    %cst_21 = arith.constant dense<0.000000e+00> : vector<8x128xf32>
    %38 = tpu.matmul %29, %0, %cst_21 {dimension_numbers = #tpu.dot_dimension_numbers<[1], [0], [0], [1], [0, 0, 1, 1], [], []>} : vector<8x128xf32>, vector<128x128xf32>, vector<8x128xf32> -> vector<8x128xf32>
    %39 = arith.addf %38, %37 : vector<8x128xf32>
    %40 = math.tanh %39 : vector<8x128xf32>
    %c1_i32_22 = arith.constant 1 : i32
    %41 = arith.subi %c2_i32, %c1_i32_22 : i32
    %42 = arith.index_cast %41 : i32 to index
    %c0_23 = arith.constant 0 : index
    %c0_24 = arith.constant 0 : index
    %43 = vector.load %arg8[%42, %c0_23, %c0_24] : memref<8x8x128xf32, #tpu.memory_space<vmem>>, vector<1x8x128xf32>
    %44 = vector.shape_cast %43 : vector<1x8x128xf32> to vector<8x128xf32>
    %45 = vector.shape_cast %40 : vector<8x128xf32> to vector<1x8x128xf32>
    tpu.vector_store %arg8[%42, %c0_23, %c0_24], %45 {strides = array<i32>} : memref<8x8x128xf32, #tpu.memory_space<vmem>>, vector<1x8x128xf32>,
    %c3_i32 = arith.constant 3 : i32
    %46 = arith.index_cast %c3_i32 : i32 to index
    %c0_25 = arith.constant 0 : index
    %c0_26 = arith.constant 0 : index
    %47 = vector.load %arg8[%46, %c0_25, %c0_26] : memref<8x8x128xf32, #tpu.memory_space<vmem>>, vector<1x8x128xf32>
    %48 = vector.shape_cast %47 : vector<1x8x128xf32> to vector<8x128xf32>
    %cst_27 = arith.constant dense<0.000000e+00> : vector<8x128xf32>
    %49 = tpu.matmul %40, %0, %cst_27 {dimension_numbers = #tpu.dot_dimension_numbers<[1], [0], [0], [1], [0, 0, 1, 1], [], []>} : vector<8x128xf32>, vector<128x128xf32>, vector<8x128xf32> -> vector<8x128xf32>
    %50 = arith.addf %49, %48 : vector<8x128xf32>
    %51 = math.tanh %50 : vector<8x128xf32>
    %c1_i32_28 = arith.constant 1 : i32
    %52 = arith.subi %c3_i32, %c1_i32_28 : i32
    %53 = arith.index_cast %52 : i32 to index
    %c0_29 = arith.constant 0 : index
    %c0_30 = arith.constant 0 : index
    %54 = vector.load %arg8[%53, %c0_29, %c0_30] : memref<8x8x128xf32, #tpu.memory_space<vmem>>, vector<1x8x128xf32>
    %55 = vector.shape_cast %54 : vector<1x8x128xf32> to vector<8x128xf32>
    %56 = vector.shape_cast %51 : vector<8x128xf32> to vector<1x8x128xf32>
    tpu.vector_store %arg8[%53, %c0_29, %c0_30], %56 {strides = array<i32>} : memref<8x8x128xf32, #tpu.memory_space<vmem>>, vector<1x8x128xf32>,
    %c4_i32 = arith.constant 4 : i32
    %57 = arith.index_cast %c4_i32 : i32 to index
    %c0_31 = arith.constant 0 : index
    %c0_32 = arith.constant 0 : index
    %58 = vector.load %arg8[%57, %c0_31, %c0_32] : memref<8x8x128xf32, #tpu.memory_space<vmem>>, vector<1x8x128xf32>
    %59 = vector.shape_cast %58 : vector<1x8x128xf32> to vector<8x128xf32>
    %cst_33 = arith.constant dense<0.000000e+00> : vector<8x128xf32>
    %60 = tpu.matmul %51, %0, %cst_33 {dimension_numbers = #tpu.dot_dimension_numbers<[1], [0], [0], [1], [0, 0, 1, 1], [], []>} : vector<8x128xf32>, vector<128x128xf32>, vector<8x128xf32> -> vector<8x128xf32>
    %61 = arith.addf %60, %59 : vector<8x128xf32>
    %62 = math.tanh %61 : vector<8x128xf32>
    %c1_i32_34 = arith.constant 1 : i32
    %63 = arith.subi %c4_i32, %c1_i32_34 : i32
    %64 = arith.index_cast %63 : i32 to index
    %c0_35 = arith.constant 0 : index
    %c0_36 = arith.constant 0 : index
    %65 = vector.load %arg8[%64, %c0_35, %c0_36] : memref<8x8x128xf32, #tpu.memory_space<vmem>>, vector<1x8x128xf32>
    %66 = vector.shape_cast %65 : vector<1x8x128xf32> to vector<8x128xf32>
    %67 = vector.shape_cast %62 : vector<8x128xf32> to vector<1x8x128xf32>
    tpu.vector_store %arg8[%64, %c0_35, %c0_36], %67 {strides = array<i32>} : memref<8x8x128xf32, #tpu.memory_space<vmem>>, vector<1x8x128xf32>,
    %c5_i32 = arith.constant 5 : i32
    %68 = arith.index_cast %c5_i32 : i32 to index
    %c0_37 = arith.constant 0 : index
    %c0_38 = arith.constant 0 : index
    %69 = vector.load %arg8[%68, %c0_37, %c0_38] : memref<8x8x128xf32, #tpu.memory_space<vmem>>, vector<1x8x128xf32>
    %70 = vector.shape_cast %69 : vector<1x8x128xf32> to vector<8x128xf32>
    %cst_39 = arith.constant dense<0.000000e+00> : vector<8x128xf32>
    %71 = tpu.matmul %62, %0, %cst_39 {dimension_numbers = #tpu.dot_dimension_numbers<[1], [0], [0], [1], [0, 0, 1, 1], [], []>} : vector<8x128xf32>, vector<128x128xf32>, vector<8x128xf32> -> vector<8x128xf32>
    %72 = arith.addf %71, %70 : vector<8x128xf32>
    %73 = math.tanh %72 : vector<8x128xf32>
    %c1_i32_40 = arith.constant 1 : i32
    %74 = arith.subi %c5_i32, %c1_i32_40 : i32
    %75 = arith.index_cast %74 : i32 to index
    %c0_41 = arith.constant 0 : index
    %c0_42 = arith.constant 0 : index
    %76 = vector.load %arg8[%75, %c0_41, %c0_42] : memref<8x8x128xf32, #tpu.memory_space<vmem>>, vector<1x8x128xf32>
    %77 = vector.shape_cast %76 : vector<1x8x128xf32> to vector<8x128xf32>
    %78 = vector.shape_cast %73 : vector<8x128xf32> to vector<1x8x128xf32>
    tpu.vector_store %arg8[%75, %c0_41, %c0_42], %78 {strides = array<i32>} : memref<8x8x128xf32, #tpu.memory_space<vmem>>, vector<1x8x128xf32>,
    %c6_i32 = arith.constant 6 : i32
    %79 = arith.index_cast %c6_i32 : i32 to index
    %c0_43 = arith.constant 0 : index
    %c0_44 = arith.constant 0 : index
    %80 = vector.load %arg8[%79, %c0_43, %c0_44] : memref<8x8x128xf32, #tpu.memory_space<vmem>>, vector<1x8x128xf32>
    %81 = vector.shape_cast %80 : vector<1x8x128xf32> to vector<8x128xf32>
    %cst_45 = arith.constant dense<0.000000e+00> : vector<8x128xf32>
    %82 = tpu.matmul %73, %0, %cst_45 {dimension_numbers = #tpu.dot_dimension_numbers<[1], [0], [0], [1], [0, 0, 1, 1], [], []>} : vector<8x128xf32>, vector<128x128xf32>, vector<8x128xf32> -> vector<8x128xf32>
    %83 = arith.addf %82, %81 : vector<8x128xf32>
    %84 = math.tanh %83 : vector<8x128xf32>
    %c1_i32_46 = arith.constant 1 : i32
    %85 = arith.subi %c6_i32, %c1_i32_46 : i32
    %86 = arith.index_cast %85 : i32 to index
    %c0_47 = arith.constant 0 : index
    %c0_48 = arith.constant 0 : index
    %87 = vector.load %arg8[%86, %c0_47, %c0_48] : memref<8x8x128xf32, #tpu.memory_space<vmem>>, vector<1x8x128xf32>
    %88 = vector.shape_cast %87 : vector<1x8x128xf32> to vector<8x128xf32>
    %89 = vector.shape_cast %84 : vector<8x128xf32> to vector<1x8x128xf32>
    tpu.vector_store %arg8[%86, %c0_47, %c0_48], %89 {strides = array<i32>} : memref<8x8x128xf32, #tpu.memory_space<vmem>>, vector<1x8x128xf32>,
    %c7_i32 = arith.constant 7 : i32
    %90 = arith.index_cast %c7_i32 : i32 to index
    %c0_49 = arith.constant 0 : index
    %c0_50 = arith.constant 0 : index
    %91 = vector.load %arg8[%90, %c0_49, %c0_50] : memref<8x8x128xf32, #tpu.memory_space<vmem>>, vector<1x8x128xf32>
    %92 = vector.shape_cast %91 : vector<1x8x128xf32> to vector<8x128xf32>
    %cst_51 = arith.constant dense<0.000000e+00> : vector<8x128xf32>
    %93 = tpu.matmul %84, %0, %cst_51 {dimension_numbers = #tpu.dot_dimension_numbers<[1], [0], [0], [1], [0, 0, 1, 1], [], []>} : vector<8x128xf32>, vector<128x128xf32>, vector<8x128xf32> -> vector<8x128xf32>
    %94 = arith.addf %93, %92 : vector<8x128xf32>
    %95 = math.tanh %94 : vector<8x128xf32>
    %c1_i32_52 = arith.constant 1 : i32
    %96 = arith.subi %c7_i32, %c1_i32_52 : i32
    %97 = arith.index_cast %96 : i32 to index
    %c0_53 = arith.constant 0 : index
    %c0_54 = arith.constant 0 : index
    %98 = vector.load %arg8[%97, %c0_53, %c0_54] : memref<8x8x128xf32, #tpu.memory_space<vmem>>, vector<1x8x128xf32>
    %99 = vector.shape_cast %98 : vector<1x8x128xf32> to vector<8x128xf32>
    %100 = vector.shape_cast %95 : vector<8x128xf32> to vector<1x8x128xf32>
    tpu.vector_store %arg8[%97, %c0_53, %c0_54], %100 {strides = array<i32>} : memref<8x8x128xf32, #tpu.memory_space<vmem>>, vector<1x8x128xf32>,
    %c7_i32_55 = arith.constant 7 : i32
    %cst_56 = arith.constant dense<0.000000e+00> : vector<8x128xf32>
    %101 = tpu.matmul %95, %0, %cst_56 {dimension_numbers = #tpu.dot_dimension_numbers<[1], [0], [0], [1], [0, 0, 1, 1], [], []>} : vector<8x128xf32>, vector<128x128xf32>, vector<8x128xf32> -> vector<8x128xf32>
    %102 = vector.broadcast %2 : vector<1x128xf32> to vector<8x128xf32>
    %103 = arith.addf %101, %102 : vector<8x128xf32>
    %104 = math.tanh %103 : vector<8x128xf32>
    %c7 = arith.constant 7 : index
    %c0_57 = arith.constant 0 : index
    %c0_58 = arith.constant 0 : index
    %105 = vector.load %arg8[%c7, %c0_57, %c0_58] : memref<8x8x128xf32, #tpu.memory_space<vmem>>, vector<1x8x128xf32>
    %106 = vector.shape_cast %105 : vector<1x8x128xf32> to vector<8x128xf32>
    %107 = vector.shape_cast %104 : vector<8x128xf32> to vector<1x8x128xf32>
    tpu.vector_store %arg8[%c7, %c0_57, %c0_58], %107 {strides = array<i32>} : memref<8x8x128xf32, #tpu.memory_space<vmem>>, vector<1x8x128xf32>,
    %c0_59 = arith.constant 0 : index
    %c0_60 = arith.constant 0 : index
    %c0_61 = arith.constant 0 : index
    %108 = vector.load %arg8[%c0_59, %c0_60, %c0_61] : memref<8x8x128xf32, #tpu.memory_space<vmem>>, vector<8x8x128xf32>
    %c0_62 = arith.constant 0 : index
    %c0_63 = arith.constant 0 : index
    %109 = vector.load %arg5[%c0_62, %c0_63] : memref<1x128xf32, #tpu.memory_space<vmem>>, vector<1x128xf32>
    %110 = vector.shape_cast %109 : vector<1x128xf32> to vector<1x1x128xf32>
    %111 = vector.broadcast %110 : vector<1x1x128xf32> to vector<8x8x128xf32>
    %112 = arith.mulf %108, %111 : vector<8x8x128xf32>
    %cst_64 = arith.constant dense<0.000000e+00> : vector<8x8xf32>
    %113 = vector.multi_reduction <add>, %112, %cst_64 [2] : vector<8x8x128xf32> to vector<8x8xf32>
    %c0_65 = arith.constant 0 : index
    %c0_66 = arith.constant 0 : index
    %114 = vector.load %arg6[%c0_65, %c0_66] : memref<1x1xf32, #tpu.memory_space<vmem>>, vector<1x1xf32>
    %115 = vector.broadcast %114 : vector<1x1xf32> to vector<8x8xf32>
    %116 = arith.addf %113, %115 : vector<8x8xf32>
    %c0_67 = arith.constant 0 : index
    %c0_68 = arith.constant 0 : index
    %c0_69 = arith.constant 0 : index
    %117 = vector.load %arg7[%c0_67, %c0_68, %c0_69] : memref<1x8x8xf32, #tpu.memory_space<vmem>>, vector<1x8x8xf32>
    %118 = vector.shape_cast %117 : vector<1x8x8xf32> to vector<8x8xf32>
    %119 = vector.shape_cast %116 : vector<8x8xf32> to vector<1x8x8xf32>
    tpu.vector_store %arg7[%c0_67, %c0_68, %c0_69], %119 {strides = array<i32>} : memref<1x8x8xf32, #tpu.memory_space<vmem>>, vector<1x8x8xf32>,
    return
  }
  func.func @transform_0(%arg0: i32) -> (i32, i32, i32) {
    %c0_i32 = arith.constant 0 : i32
    %c0_i32_0 = arith.constant 0 : i32
    %c0_i32_1 = arith.constant 0 : i32
    return %arg0, %c0_i32, %c0_i32_0 : i32, i32, i32
  }
  func.func @transform_1(%arg0: i32) -> (i32, i32) {
    %c0_i32 = arith.constant 0 : i32
    %c0_i32_0 = arith.constant 0 : i32
    %c0_i32_1 = arith.constant 0 : i32
    return %c0_i32, %c0_i32_0 : i32, i32
  }
  func.func @transform_2(%arg0: i32) -> (i32, i32) {
    %c0_i32 = arith.constant 0 : i32
    %c0_i32_0 = arith.constant 0 : i32
    %c0_i32_1 = arith.constant 0 : i32
    return %c0_i32, %c0_i32_0 : i32, i32
  }
  func.func @transform_3(%arg0: i32) -> (i32, i32) {
    %c0_i32 = arith.constant 0 : i32
    %c0_i32_0 = arith.constant 0 : i32
    %c0_i32_1 = arith.constant 0 : i32
    return %c0_i32, %c0_i32_0 : i32, i32
  }
  func.func @transform_4(%arg0: i32) -> (i32, i32) {
    %c0_i32 = arith.constant 0 : i32
    %c0_i32_0 = arith.constant 0 : i32
    %c0_i32_1 = arith.constant 0 : i32
    return %c0_i32, %c0_i32_0 : i32, i32
  }
  func.func @transform_5(%arg0: i32) -> (i32, i32) {
    %c0_i32 = arith.constant 0 : i32
    %c0_i32_0 = arith.constant 0 : i32
    %c0_i32_1 = arith.constant 0 : i32
    return %c0_i32, %c0_i32_0 : i32, i32
  }
  func.func @transform_6(%arg0: i32) -> (i32, i32, i32) {
    %c0_i32 = arith.constant 0 : i32
    %c0_i32_0 = arith.constant 0 : i32
    %c0_i32_1 = arith.constant 0 : i32
    return %arg0, %c0_i32, %c0_i32_0 : i32, i32, i32
  }
}

</mosaic_0001>

<bundles_post_ra>
// kernel: tpu_custom_call.1
= control target key start
LH: loop header
LB: loop body
LE: loop exit
PB: predicated region body
PF: predicated region fallthrough
CT: control target
= control target key end

     0   :  { %s1833_s0 = inlined_call_operand.hbm [shape: f32[1,8,8], index: 0, kind: input, shape index: {}]   ;;  %s1834_s1 = inlined_call_operand.vmem [shape: f32[1,128], index: 1, kind: input, shape index: {}]   ;;  %s1835_s2 = inlined_call_operand.hbm [shape: f32[128,128], index: 2, kind: input, shape index: {}]   ;;  %s1836_s3 = inlined_call_operand.vmem [shape: f32[1,128], index: 3, kind: input, shape index: {}]   ;;  %s1837_s4 = inlined_call_operand.vmem [shape: f32[1,128], index: 4, kind: input, shape index: {}]   ;;  %s1838_s5 = inlined_call_operand.<no memory space> [shape: f32[1,1], index: 5, kind: input, shape index: {}]   ;;  %s1839_s6 = inlined_call_operand.hbm [shape: f32[1,8,8], index: 6, kind: output, shape index: {}]  }
   0x1   :  { %v11_v0 = vstv %s1838_s5 }
   0x2   :  { %12 = vst [vmem:[#allocation3] sm:$0x1] %v11_v0 }
   0x3   :  { %13 = vsyncpa [#allocation5], 0 }
   0x4   :  { %14 = vsyncpa [#allocation8], 0 }
   0x5   :  { %15 = vsyncpa [#allocation6], 0  ;;  %s1406_s23 = smov [#allocation4]   ;;  %s1407_s25 = smov [#allocation7]  }
   0x6   :  { %s22_s24 = sshll.u32 %s1406_s23, 4  ;;  %s33_s26 = sshll.u32 %s1407_s25, 4  ;;  %s23_s24 = int_to_ptr.vmem [resolvable:$true] %s22_s24  ;;  %s34_s26 = int_to_ptr.vmem [resolvable:$true] %s33_s26 }
   0x7   :  { %s1348_s27 = scalar_lea.vmem %s23_s24, 128  ;;  %p1353_p1 = scmp.lt.s32.totalorder %s23_s24, %s23_s24 }
   0x8   :  { %p1349_p0 = scmp.ne.s32.totalorder %s23_s24, %s1348_s27  ;;  %p1354_p2 = scmp.lt.s32.totalorder %s1348_s27, %s1348_s27 }
   0xa   :  { %p1355_p3 = por %p1354_p2, %p1353_p1 }
   0xc   :  { %p1356_p4 = pnand %p1355_p3, %p1349_p0 }
   0xe   :  { %1359 = shalt.err (!%p1356_p4)
}
   0xf   :  { %25 = dma.hbm_to_vmem [thread:$0]  %s1833_s0, 128, %s23_s24, [#allocation5]  }
  0x10   :  { %s1368_s5 = scalar_lea.vmem %s34_s26, 2048  ;;  %p1373_p6 = scmp.lt.s32.totalorder %s34_s26, %s34_s26 }
  0x11   :  { %p1369_p5 = scmp.ne.s32.totalorder %s34_s26, %s1368_s5  ;;  %p1374_p7 = scmp.lt.s32.totalorder %s1368_s5, %s1368_s5 }
  0x13   :  { %p1375_p8 = por %p1374_p7, %p1373_p6 }
  0x15   :  { %p1376_p9 = pnand %p1375_p8, %p1369_p5 }
  0x17   :  { %1379 = shalt.err (!%p1376_p9)
}
  0x18   :  { %s1408_s30 = smov 128   ;;  %s1409_s7 = smov 8  }
  0x19   :  { %39 = dma.hbm_to_vmem [thread:$0]  %s1835_s2, 2048, %s34_s26, [#allocation8], %s1408_s30, %s1408_s30, %s1409_s7  }
  0x1a   :  { %1400 = dma.done.wait [#allocation5], 128  }
  0x1b   :  { %1401 = vsyncadd [#allocation5], 4294967168 }
  0x1c   :  { %1402 = dma.done.wait [#allocation8], 2048  }
  0x1d   :  { %1403 = vsyncadd [#allocation8], 4294965248  ;;  %v71_v1 = vlaneseq  ;;  %v1410_v2 = vmov 0.0   ;;  %vm1411_vm0 = vmmov 0   ;;  %v1468_v5 = vld [vmem:[#allocation4] sm:$0xff]  ;;  %v1472_v7 = vld [vmem:[#allocation7 + $0x70] sm:$0xff] }
  0x1e   :  { %1032 = vmatprep.subr.mxu0 %v1410_v2  ;;  %1067 = vmatprep.subr.mxu1 %v1410_v2  ;;  %v1470_v6 = vld [vmem:[#allocation7 + $0x78] sm:$0xff]  ;;  %v1478_v9 = vld [vmem:[#allocation7 + $0x68] sm:$0xff]  ;;  %v1483_v10 = vld [vmem:[#allocation7 + $0x60] sm:$0xff]  ;;  %vm858_vm2 = vcmask 1041409   ;;  %vm860_vm3 = vcmask 1042434   ;;  %vm862_vm4 = vcmask 1043459  }
  0x1f   :  { %v1461_v3 = vshrl.u32 %v71_v1, 7  ;;  %1064 = vmatprep.mubr.msk.f32.mxu0 %vm1411_vm0, %v1410_v2  ;;  %1099 = vmatprep.mubr.msk.f32.mxu1 %vm1411_vm0, %v1410_v2  ;;  %v1489_v11 = vld [vmem:[#allocation7 + $0x58] sm:$0xff]  ;;  %v1495_v12 = vld [vmem:[#allocation7 + $0x50] sm:$0xff]  ;;  %v1501_v13 = vld [vmem:[#allocation7 + $0x48] sm:$0xff]  ;;  %v1586_v34 = vand.u32 127, %v71_v1  ;;  %vm864_vm5 = vcmask 1044484  }
  0x20   :  { %1033 = vmatpush3.msra.mxu0 %v1470_v6  ;;  %1068 = vmatpush3.msra.mxu1 %v1470_v6  ;;  %v1509_v16 = vld [vmem:[#allocation7 + $0x40] sm:$0xff]  ;;  %v1516_v18 = vld [vmem:[#allocation7 + $0x38] sm:$0xff]  ;;  %v1523_v21 = vld [vmem:[#allocation7 + $0x30] sm:$0xff]  ;;  %vm866_vm6 = vcmask 1045509   ;;  %vm868_vm7 = vcmask 1046534   ;;  %vm870_vm8 = vcmask 1047559  }
  0x21   :  { %v73_v4 = vsub.s32 0, %v1461_v3  ;;  %1034 = vmatprep.subr.mxu0 %v1410_v2  ;;  %1069 = vmatprep.subr.mxu1 %v1410_v2  ;;  %v80_v14 = vsub.s32 1, %v1461_v3  ;;  %v101_v15 = vsub.s32 4, %v1461_v3  ;;  %v115_v20 = vsub.s32 6, %v1461_v3  ;;  %v1529_v22 = vld [vmem:[#allocation7 + $0x28] sm:$0xff]  ;;  %v1535_v24 = vld [vmem:[#allocation7 + $0x20] sm:$0xff] }
  0x22   :  { %1035 = vmatpush3.msra.mxu0 %v1472_v7  ;;  %1070 = vmatpush3.msra.mxu1 %v1472_v7  ;;  %v1541_v25 = vld [vmem:[#allocation7 + $0x18] sm:$0xff]  ;;  %v1546_v26 = vld [vmem:[#allocation7 + $0x10] sm:$0xff]  ;;  %v1552_v27 = vld [vmem:[#allocation7 + $0x8] sm:$0xff]  ;;  %vm165_vm1 = vcmp.lt.s32.totalorder %v1586_v34, 64  ;;  %v87_v38 = vsub.s32 2, %v1461_v3  ;;  %v94_v49 = vsub.s32 3, %v1461_v3 }
  0x23   :  { %v74_v8 = vrot.slane %v1468_v5, %v73_v4  ;;  %1036 = vmatprep.subr.mxu0 %v1410_v2  ;;  %1071 = vmatprep.subr.mxu1 %v1410_v2  ;;  %v81_v17 = vrot.slane %v1468_v5, %v80_v14  ;;  %v102_v19 = vrot.slane %v1468_v5, %v101_v15  ;;  %v1558_v28 = vld [vmem:[#allocation7] sm:$0xff]  ;;  %v1576_v29 = vld [vmem:[%s1834_s1] ss:$0 sm:$0xff]  ;;  %v893_v35 = vsel %vm165_vm1, 1.0, %v1410_v2 }
  0x24   :  { %1037 = vmatpush3.msra.mxu0 %v1478_v9  ;;  %1072 = vmatpush3.msra.mxu1 %v1478_v9  ;;  %v116_v23 = vrot.slane %v1468_v5, %v115_v20  ;;  %v1581_v31 = vld [vmem:[%s1836_s3] ss:$0 sm:$0xff]  ;;  %v88_v39 = vrot.slane %v1468_v5, %v87_v38  ;;  %v108_v50 = vsub.s32 5, %v1461_v3  ;;  %v95_v51 = vrot.slane %v1468_v5, %v94_v49 }
  0x25   :  { %76 = vbcast.lane.b32.xlu0 %v74_v8, 256  ;;  %1038 = vmatprep.subr.mxu0 %v1410_v2  ;;  %v1631_v46 = vld [vmem:[%s1837_s4] ss:$0 sm:$0xff]  ;;  %v122_v53 = vsub.s32 7, %v1461_v3  ;;  %s1413_s4 = smov [#allocation9]   ;;  %vm873_vm9 = vcmask 64512  }
  0x26   :  { %1039 = vmatpush3.msra.mxu0 %v1483_v10  ;;  %1073 = vmatprep.subr.mxu1 %v1410_v2  ;;  %v109_v52 = vrot.slane %v1468_v5, %v108_v50  ;;  %s881_s12 = sshll.u32 %s1413_s4, 4  ;;  %s882_s12 = int_to_ptr.vmem [resolvable:$true] %s881_s12 }
  0x27   :  { %1040 = vmatprep.subr.mxu0 %v1410_v2  ;;  %1074 = vmatpush3.msra.mxu1 %v1483_v10  ;;  %v123_v54 = vrot.slane %v1468_v5, %v122_v53  ;;  %s1380_s13 = scalar_lea.vmem %s882_s12, 128  ;;  %p1385_p11 = scmp.lt.s32.totalorder %s882_s12, %s882_s12 }
  0x28   :  { %1041 = vmatpush3.msra.mxu0 %v1489_v11  ;;  %1075 = vmatprep.subr.mxu1 %v1410_v2  ;;  %p1381_p10 = scmp.ne.s32.totalorder %s882_s12, %s1380_s13  ;;  %p1386_p12 = scmp.lt.s32.totalorder %s1380_s13, %s1380_s13 }
  0x29   :  { %1042 = vmatprep.subr.mxu0 %v1410_v2  ;;  %1076 = vmatpush3.msra.mxu1 %v1489_v11 }
  0x2a   :  { %1043 = vmatpush3.msra.mxu0 %v1495_v12  ;;  %1077 = vmatprep.subr.mxu1 %v1410_v2  ;;  %p1387_p13 = por %p1386_p12, %p1385_p11 }
  0x2b   :  { %1044 = vmatprep.subr.mxu0 %v1410_v2  ;;  %1078 = vmatpush3.msra.mxu1 %v1495_v12 }
  0x2c   :  { %1045 = vmatpush3.msra.mxu0 %v1501_v13  ;;  %1079 = vmatprep.subr.mxu1 %v1410_v2  ;;  %p1388_p0 = pnand %p1387_p13, %p1381_p10 }
  0x2d   :  { %1046 = vmatprep.subr.mxu0 %v1410_v2  ;;  %83 = vbcast.lane.b32.xlu0 %v81_v17, 256 }
  0x2e   :  { %1047 = vmatpush3.msra.mxu0 %v1509_v16  ;;  %1080 = vmatpush3.msra.mxu1 %v1501_v13 }
  0x2f   :  { %1048 = vmatprep.subr.mxu0 %v1410_v2  ;;  %1081 = vmatprep.subr.mxu1 %v1410_v2 }
  0x30   :  { %1049 = vmatpush3.msra.mxu0 %v1516_v18  ;;  %1082 = vmatpush3.msra.mxu1 %v1509_v16 }
  0x31   :  { %1050 = vmatprep.subr.mxu0 %v1410_v2  ;;  %104 = vbcast.lane.b32.xlu0 %v102_v19, 256 }
  0x32   :  { %1051 = vmatpush3.msra.mxu0 %v1523_v21  ;;  %1083 = vmatprep.subr.mxu1 %v1410_v2 }
  0x33   :  { %1052 = vmatprep.subr.mxu0 %v1410_v2  ;;  %1084 = vmatpush3.msra.mxu1 %v1516_v18 }
  0x34   :  { %1053 = vmatpush3.msra.mxu0 %v1529_v22  ;;  %1085 = vmatprep.subr.mxu1 %v1410_v2 }
  0x35   :  { %1054 = vmatprep.subr.mxu0 %v1410_v2  ;;  %118 = vbcast.lane.b32.xlu0 %v116_v23, 256 }
  0x36   :  { %1055 = vmatpush3.msra.mxu0 %v1535_v24  ;;  %1086 = vmatpush3.msra.mxu1 %v1523_v21 }
  0x37   :  { %1056 = vmatprep.subr.mxu0 %v1410_v2  ;;  %1087 = vmatprep.subr.mxu1 %v1410_v2 }
  0x38   :  { %1057 = vmatpush3.msra.mxu0 %v1541_v25  ;;  %1088 = vmatpush3.msra.mxu1 %v1529_v22 }
  0x39   :  { %1058 = vmatprep.subr.mxu0 %v1410_v2  ;;  %1089 = vmatprep.subr.mxu1 %v1410_v2 }
  0x3a   :  { %1059 = vmatpush3.msra.mxu0 %v1546_v26  ;;  %1090 = vmatpush3.msra.mxu1 %v1535_v24 }
  0x3b   :  { %1060 = vmatprep.subr.mxu0 %v1410_v2  ;;  %1091 = vmatprep.subr.mxu1 %v1410_v2 }
  0x3c   :  { %1061 = vmatpush3.msra.mxu0 %v1552_v27  ;;  %1092 = vmatpush3.msra.mxu1 %v1541_v25 }
  0x3d   :  { %1062 = vmatprep.subr.mxu0 %v1410_v2  ;;  %1093 = vmatprep.subr.mxu1 %v1410_v2 }
  0x3e   :  { %1063 = vmatpush3.msra.mxu0 %v1558_v28  ;;  %1094 = vmatpush3.msra.mxu1 %v1546_v26 }
  0x3f   :  { %1095 = vmatprep.subr.mxu1 %v1410_v2  ;;  %1102 = vmatprep.subr.mxu0 %v1410_v2 }
  0x40   :  { %1096 = vmatpush3.msra.mxu1 %v1552_v27  ;;  %90 = vbcast.lane.b32.xlu1 %v88_v39, 256 }
  0x41   :  { %1097 = vmatprep.subr.mxu1 %v1410_v2 }
  0x42   :  { %1098 = vmatpush3.msra.mxu1 %v1558_v28 }
  0x43   :  { %1137 = vmatprep.subr.mxu1 %v1410_v2 }
  0x44   :  { %97 = vbcast.lane.b32.xlu1 %v95_v51, 256 }
  0x48   :  { %111 = vbcast.lane.b32.xlu1 %v109_v52, 256 }
  0x4c   :  { %125 = vbcast.lane.b32.xlu1 %v123_v54, 256 }
  0x97   :  { %v77_v30 = vpop.permute.xlu0 %76 }
  0x98   :  { %v133_v32 = vmul.f32 %v1576_v29, %v77_v30 }
  0x9a   :  { %v147_v33 = vadd.f32 %v1581_v31, %v133_v32 }
  0x9c   :  { %1322 = vtanh.f32 %v147_v33 }
  0x9f   :  { %v84_v40 = vpop.permute.xlu0 %83 }
  0xa0   :  { %v134_v41 = vmul.f32 %v1576_v29, %v84_v40 }
  0xa2   :  { %v148_v42 = vadd.f32 %v1581_v31, %v134_v41 }
  0xa3   :  { %v105_v17 = vpop.permute.xlu0 %104 }
  0xa4   :  { %v137_v19 = vmul.f32 %v1576_v29, %v105_v17 }
  0xa6   :  { %v151_v20 = vadd.f32 %v1581_v31, %v137_v19 }
  0xa9   :  { %v1323_v36 = vpop.eup %1322 }
  0xaa   :  { %v170_v37 = vmul.f32 %v1323_v36, %v893_v35 }
  0xac   :  { %1065 = vmatmul.mubr.f32.vlgmr.msra.gmra.mxu0 %v170_v37 }
  0xad   :  { %1103 = vmatpush3.msra.mxu0 %v1470_v6  ;;  %1134 = vmatprep.mubr.msk.f32.mxu0 %vm1411_vm0, %v1410_v2 }
  0xae   :  { %1104 = vmatprep.subr.mxu0 %v1410_v2 }
  0xaf   :  { %1105 = vmatpush3.msra.mxu0 %v1472_v7 }
  0xb0   :  { %1106 = vmatprep.subr.mxu0 %v1410_v2 }
  0xb1   :  { %1107 = vmatpush3.msra.mxu0 %v1478_v9 }
  0xb2   :  { %1108 = vmatprep.subr.mxu0 %v1410_v2  ;;  %v91_v55 = vpop.permute.xlu1 %90 }
  0xb3   :  { %1109 = vmatpush3.msra.mxu0 %v1483_v10  ;;  %v135_v56 = vmul.f32 %v1576_v29, %v91_v55  ;;  %v828_v55 = vsub.s32 %v1586_v34, %v1461_v3 }
  0xb4   :  { %1110 = vmatprep.subr.mxu0 %v1410_v2 }
  0xb5   :  { %1111 = vmatpush3.msra.mxu0 %v1489_v11  ;;  %v149_v57 = vadd.f32 %v1581_v31, %v135_v56 }
  0xb6   :  { %1112 = vmatprep.subr.mxu0 %v1410_v2  ;;  %v98_v63 = vpop.permute.xlu1 %97 }
  0xb7   :  { %1113 = vmatpush3.msra.mxu0 %v1495_v12  ;;  %v136_v0 = vmul.f32 %v1576_v29, %v98_v63 }
  0xb8   :  { %1114 = vmatprep.subr.mxu0 %v1410_v2 }
  0xb9   :  { %1115 = vmatpush3.msra.mxu0 %v1501_v13  ;;  %v150_v1 = vadd.f32 %v1581_v31, %v136_v0 }
  0xba   :  { %1116 = vmatprep.subr.mxu0 %v1410_v2  ;;  %v112_v36 = vpop.permute.xlu1 %111 }
  0xbb   :  { %1117 = vmatpush3.msra.mxu0 %v1509_v16  ;;  %v138_v37 = vmul.f32 %v1576_v29, %v112_v36 }
  0xbc   :  { %1118 = vmatprep.subr.mxu0 %v1410_v2 }
  0xbd   :  { %1119 = vmatpush3.msra.mxu0 %v1516_v18  ;;  %v152_v38 = vadd.f32 %v1581_v31, %v138_v37 }
  0xbe   :  { %1120 = vmatprep.subr.mxu0 %v1410_v2 }
  0xbf   :  { %1121 = vmatpush3.msra.mxu0 %v1523_v21 }
  0xc0   :  { %1122 = vmatprep.subr.mxu0 %v1410_v2 }
  0xc1   :  { %1123 = vmatpush3.msra.mxu0 %v1529_v22 }
  0xc2   :  { %1124 = vmatprep.subr.mxu0 %v1410_v2 }
  0xc3   :  { %1125 = vmatpush3.msra.mxu0 %v1535_v24 }
  0xc4   :  { %1126 = vmatprep.subr.mxu0 %v1410_v2 }
  0xc5   :  { %1127 = vmatpush3.msra.mxu0 %v1541_v25 }
  0xc6   :  { %1128 = vmatprep.subr.mxu0 %v1410_v2 }
  0xc7   :  { %1129 = vmatpush3.msra.mxu0 %v1546_v26 }
  0xc8   :  { %1130 = vmatprep.subr.mxu0 %v1410_v2 }
  0xc9   :  { %1131 = vmatpush3.msra.mxu0 %v1552_v27 }
  0xca   :  { %1132 = vmatprep.subr.mxu0 %v1410_v2 }
  0xcb   :  { %1133 = vmatpush3.msra.mxu0 %v1558_v28 }
  0xcc   :  { %1172 = vmatprep.subr.mxu0 %v1410_v2 }
 0x16c   :  { %v239_v43 = vpop.f32.mrf.mxu0 }
 0x16d   :  { %v240_v44 = vadd.f32 %v239_v43, %v148_v42 }
 0x16e   :  { %v1066_v45 = vpop.f32.mrf.mxu0 }
 0x16f   :  { %1324 = vtanh.f32 %v240_v44  ;;  %v895_v44 = vld [vmem:[#allocation3] ss:$0 sm:$0xff] }
 0x17c   :  { %v1325_v47 = vpop.eup %1324 }
 0x17d   :  { %1100 = vmatmul.mubr.f32.vlgmr.msra.gmra.mxu1 %v1325_v47  ;;  %v776_v48 = vmul.f32 %v1325_v47, %v1631_v46 }
 0x17e   :  { %1138 = vmatpush3.msra.mxu1 %v1470_v6  ;;  %1169 = vmatprep.mubr.msk.f32.mxu1 %vm1411_vm0, %v1410_v2 }
 0x17f   :  { %784 = vadd.xlane.f32.xlu0 %v776_v48  ;;  %1139 = vmatprep.subr.mxu1 %v1410_v2 }
 0x180   :  { %1140 = vmatpush3.msra.mxu1 %v1472_v7 }
 0x181   :  { %1141 = vmatprep.subr.mxu1 %v1410_v2 }
 0x182   :  { %1142 = vmatpush3.msra.mxu1 %v1478_v9 }
 0x183   :  { %1143 = vmatprep.subr.mxu1 %v1410_v2 }
 0x184   :  { %1144 = vmatpush3.msra.mxu1 %v1483_v10 }
 0x185   :  { %1145 = vmatprep.subr.mxu1 %v1410_v2 }
 0x186   :  { %1146 = vmatpush3.msra.mxu1 %v1489_v11 }
 0x187   :  { %1147 = vmatprep.subr.mxu1 %v1410_v2 }
 0x188   :  { %1148 = vmatpush3.msra.mxu1 %v1495_v12 }
 0x189   :  { %1149 = vmatprep.subr.mxu1 %v1410_v2 }
 0x18a   :  { %1150 = vmatpush3.msra.mxu1 %v1501_v13 }
 0x18b   :  { %1151 = vmatprep.subr.mxu1 %v1410_v2 }
 0x18c   :  { %1152 = vmatpush3.msra.mxu1 %v1509_v16 }
 0x18d   :  { %1153 = vmatprep.subr.mxu1 %v1410_v2 }
 0x18e   :  { %1154 = vmatpush3.msra.mxu1 %v1516_v18 }
 0x18f   :  { %1155 = vmatprep.subr.mxu1 %v1410_v2 }
 0x190   :  { %1156 = vmatpush3.msra.mxu1 %v1523_v21 }
 0x191   :  { %1157 = vmatprep.subr.mxu1 %v1410_v2 }
 0x192   :  { %1158 = vmatpush3.msra.mxu1 %v1529_v22 }
 0x193   :  { %1159 = vmatprep.subr.mxu1 %v1410_v2 }
 0x194   :  { %1160 = vmatpush3.msra.mxu1 %v1535_v24 }
 0x195   :  { %1161 = vmatprep.subr.mxu1 %v1410_v2 }
 0x196   :  { %1162 = vmatpush3.msra.mxu1 %v1541_v25 }
 0x197   :  { %1163 = vmatprep.subr.mxu1 %v1410_v2 }
 0x198   :  { %1164 = vmatpush3.msra.mxu1 %v1546_v26 }
 0x199   :  { %1165 = vmatprep.subr.mxu1 %v1410_v2 }
 0x19a   :  { %1166 = vmatpush3.msra.mxu1 %v1552_v27 }
 0x19b   :  { %1167 = vmatprep.subr.mxu1 %v1410_v2 }
 0x19c   :  { %1168 = vmatpush3.msra.mxu1 %v1558_v28 }
 0x19d   :  { %1207 = vmatprep.subr.mxu1 %v1410_v2 }
 0x23d   :  { %v313_v58 = vpop.f32.mrf.mxu1 }
 0x23e   :  { %v314_v59 = vadd.f32 %v313_v58, %v149_v57 }
 0x23f   :  { %v1101_v60 = vpop.f32.mrf.mxu1 }
 0x240   :  { %1326 = vtanh.f32 %v314_v59 }
 0x24d   :  { %v1327_v61 = vpop.eup %1326 }
 0x24e   :  { %1135 = vmatmul.mubr.f32.vlgmr.msra.gmra.mxu0 %v1327_v61  ;;  %v777_v62 = vmul.f32 %v1327_v61, %v1631_v46 }
 0x24f   :  { %1173 = vmatpush3.msra.mxu0 %v1470_v6  ;;  %1204 = vmatprep.mubr.msk.f32.mxu0 %vm1411_vm0, %v1410_v2 }
 0x250   :  { %786 = vadd.xlane.f32.xlu1 %v777_v62  ;;  %1174 = vmatprep.subr.mxu0 %v1410_v2 }
 0x251   :  { %1175 = vmatpush3.msra.mxu0 %v1472_v7 }
 0x252   :  { %1176 = vmatprep.subr.mxu0 %v1410_v2 }
 0x253   :  { %1177 = vmatpush3.msra.mxu0 %v1478_v9 }
 0x254   :  { %1178 = vmatprep.subr.mxu0 %v1410_v2 }
 0x255   :  { %1179 = vmatpush3.msra.mxu0 %v1483_v10 }
 0x256   :  { %1180 = vmatprep.subr.mxu0 %v1410_v2 }
 0x257   :  { %1181 = vmatpush3.msra.mxu0 %v1489_v11 }
 0x258   :  { %1182 = vmatprep.subr.mxu0 %v1410_v2 }
 0x259   :  { %1183 = vmatpush3.msra.mxu0 %v1495_v12 }
 0x25a   :  { %1184 = vmatprep.subr.mxu0 %v1410_v2 }
 0x25b   :  { %1185 = vmatpush3.msra.mxu0 %v1501_v13 }
 0x25c   :  { %1186 = vmatprep.subr.mxu0 %v1410_v2 }
 0x25d   :  { %1187 = vmatpush3.msra.mxu0 %v1509_v16 }
 0x25e   :  { %1188 = vmatprep.subr.mxu0 %v1410_v2 }
 0x25f   :  { %1189 = vmatpush3.msra.mxu0 %v1516_v18 }
 0x260   :  { %1190 = vmatprep.subr.mxu0 %v1410_v2 }
 0x261   :  { %1191 = vmatpush3.msra.mxu0 %v1523_v21 }
 0x262   :  { %1192 = vmatprep.subr.mxu0 %v1410_v2 }
 0x263   :  { %1193 = vmatpush3.msra.mxu0 %v1529_v22 }
 0x264   :  { %1194 = vmatprep.subr.mxu0 %v1410_v2 }
 0x265   :  { %1195 = vmatpush3.msra.mxu0 %v1535_v24 }
 0x266   :  { %1196 = vmatprep.subr.mxu0 %v1410_v2 }
 0x267   :  { %1197 = vmatpush3.msra.mxu0 %v1541_v25 }
 0x268   :  { %1198 = vmatprep.subr.mxu0 %v1410_v2 }
 0x269   :  { %1199 = vmatpush3.msra.mxu0 %v1546_v26 }
 0x26a   :  { %1200 = vmatprep.subr.mxu0 %v1410_v2 }
 0x26b   :  { %1201 = vmatpush3.msra.mxu0 %v1552_v27 }
 0x26c   :  { %1202 = vmatprep.subr.mxu0 %v1410_v2 }
 0x26d   :  { %1203 = vmatpush3.msra.mxu0 %v1558_v28 }
 0x26e   :  { %1242 = vmatprep.subr.mxu0 %v1410_v2 }
 0x30e   :  { %v387_v4 = vpop.f32.mrf.mxu0 }
 0x30f   :  { %v388_v5 = vadd.f32 %v387_v4, %v150_v1 }
 0x310   :  { %v1136_v8 = vpop.f32.mrf.mxu0 }
 0x311   :  { %1328 = vtanh.f32 %v388_v5 }
 0x31e   :  { %v1329_v14 = vpop.eup %1328 }
 0x31f   :  { %1170 = vmatmul.mubr.f32.vlgmr.msra.gmra.mxu1 %v1329_v14  ;;  %v778_v15 = vmul.f32 %v1329_v14, %v1631_v46 }
 0x320   :  { %1208 = vmatpush3.msra.mxu1 %v1470_v6  ;;  %1239 = vmatprep.mubr.msk.f32.mxu1 %vm1411_vm0, %v1410_v2 }
 0x321   :  { %788 = vadd.xlane.f32.xlu0 %v778_v15  ;;  %1209 = vmatprep.subr.mxu1 %v1410_v2 }
 0x322   :  { %1210 = vmatpush3.msra.mxu1 %v1472_v7 }
 0x323   :  { %1211 = vmatprep.subr.mxu1 %v1410_v2 }
 0x324   :  { %1212 = vmatpush3.msra.mxu1 %v1478_v9 }
 0x325   :  { %1213 = vmatprep.subr.mxu1 %v1410_v2 }
 0x326   :  { %1214 = vmatpush3.msra.mxu1 %v1483_v10 }
 0x327   :  { %1215 = vmatprep.subr.mxu1 %v1410_v2 }
 0x328   :  { %1216 = vmatpush3.msra.mxu1 %v1489_v11 }
 0x329   :  { %1217 = vmatprep.subr.mxu1 %v1410_v2 }
 0x32a   :  { %1218 = vmatpush3.msra.mxu1 %v1495_v12 }
 0x32b   :  { %1219 = vmatprep.subr.mxu1 %v1410_v2 }
 0x32c   :  { %1220 = vmatpush3.msra.mxu1 %v1501_v13 }
 0x32d   :  { %1221 = vmatprep.subr.mxu1 %v1410_v2 }
 0x32e   :  { %1222 = vmatpush3.msra.mxu1 %v1509_v16 }
 0x32f   :  { %1223 = vmatprep.subr.mxu1 %v1410_v2 }
 0x330   :  { %1224 = vmatpush3.msra.mxu1 %v1516_v18 }
 0x331   :  { %1225 = vmatprep.subr.mxu1 %v1410_v2 }
 0x332   :  { %1226 = vmatpush3.msra.mxu1 %v1523_v21 }
 0x333   :  { %1227 = vmatprep.subr.mxu1 %v1410_v2 }
 0x334   :  { %1228 = vmatpush3.msra.mxu1 %v1529_v22 }
 0x335   :  { %1229 = vmatprep.subr.mxu1 %v1410_v2 }
 0x336   :  { %1230 = vmatpush3.msra.mxu1 %v1535_v24 }
 0x337   :  { %1231 = vmatprep.subr.mxu1 %v1410_v2 }
 0x338   :  { %1232 = vmatpush3.msra.mxu1 %v1541_v25 }
 0x339   :  { %1233 = vmatprep.subr.mxu1 %v1410_v2 }
 0x33a   :  { %1234 = vmatpush3.msra.mxu1 %v1546_v26 }
 0x33b   :  { %1235 = vmatprep.subr.mxu1 %v1410_v2 }
 0x33c   :  { %1236 = vmatpush3.msra.mxu1 %v1552_v27 }
 0x33d   :  { %1237 = vmatprep.subr.mxu1 %v1410_v2 }
 0x33e   :  { %1238 = vmatpush3.msra.mxu1 %v1558_v28 }
 0x33f   :  { %1277 = vmatprep.subr.mxu1 %v1410_v2 }
 0x3df   :  { %v461_v23 = vpop.f32.mrf.mxu1 }
 0x3e0   :  { %v462_v30 = vadd.f32 %v461_v23, %v151_v20 }
 0x3e1   :  { %v1171_v32 = vpop.f32.mrf.mxu1 }
 0x3e2   :  { %1330 = vtanh.f32 %v462_v30 }
 0x3ef   :  { %v1331_v33 = vpop.eup %1330 }
 0x3f0   :  { %1205 = vmatmul.mubr.f32.vlgmr.msra.gmra.mxu0 %v1331_v33  ;;  %v779_v35 = vmul.f32 %v1331_v33, %v1631_v46 }
 0x3f1   :  { %1243 = vmatpush3.msra.mxu0 %v1470_v6  ;;  %1274 = vmatprep.mubr.msk.f32.mxu0 %vm1411_vm0, %v1410_v2 }
 0x3f2   :  { %790 = vadd.xlane.f32.xlu0 %v779_v35  ;;  %1244 = vmatprep.subr.mxu0 %v1410_v2 }
 0x3f3   :  { %1245 = vmatpush3.msra.mxu0 %v1472_v7 }
 0x3f4   :  { %1246 = vmatprep.subr.mxu0 %v1410_v2 }
 0x3f5   :  { %1247 = vmatpush3.msra.mxu0 %v1478_v9 }
 0x3f6   :  { %1248 = vmatprep.subr.mxu0 %v1410_v2 }
 0x3f7   :  { %1249 = vmatpush3.msra.mxu0 %v1483_v10 }
 0x3f8   :  { %1250 = vmatprep.subr.mxu0 %v1410_v2 }
 0x3f9   :  { %1251 = vmatpush3.msra.mxu0 %v1489_v11 }
 0x3fa   :  { %1252 = vmatprep.subr.mxu0 %v1410_v2 }
 0x3fb   :  { %1253 = vmatpush3.msra.mxu0 %v1495_v12 }
 0x3fc   :  { %1254 = vmatprep.subr.mxu0 %v1410_v2 }
 0x3fd   :  { %1255 = vmatpush3.msra.mxu0 %v1501_v13 }
 0x3fe   :  { %1256 = vmatprep.subr.mxu0 %v1410_v2 }
 0x3ff   :  { %1257 = vmatpush3.msra.mxu0 %v1509_v16 }
 0x400   :  { %1258 = vmatprep.subr.mxu0 %v1410_v2 }
 0x401   :  { %1259 = vmatpush3.msra.mxu0 %v1516_v18 }
 0x402   :  { %1260 = vmatprep.subr.mxu0 %v1410_v2 }
 0x403   :  { %1261 = vmatpush3.msra.mxu0 %v1523_v21 }
 0x404   :  { %1262 = vmatprep.subr.mxu0 %v1410_v2 }
 0x405   :  { %1263 = vmatpush3.msra.mxu0 %v1529_v22 }
 0x406   :  { %1264 = vmatprep.subr.mxu0 %v1410_v2 }
 0x407   :  { %1265 = vmatpush3.msra.mxu0 %v1535_v24 }
 0x408   :  { %1266 = vmatprep.subr.mxu0 %v1410_v2 }
 0x409   :  { %1267 = vmatpush3.msra.mxu0 %v1541_v25 }
 0x40a   :  { %1268 = vmatprep.subr.mxu0 %v1410_v2 }
 0x40b   :  { %1269 = vmatpush3.msra.mxu0 %v1546_v26 }
 0x40c   :  { %1270 = vmatprep.subr.mxu0 %v1410_v2 }
 0x40d   :  { %1271 = vmatpush3.msra.mxu0 %v1552_v27 }
 0x40e   :  { %1272 = vmatprep.subr.mxu0 %v1410_v2 }
 0x40f   :  { %1273 = vmatpush3.msra.mxu0 %v1558_v28 }
 0x4b0   :  { %v535_v39 = vpop.f32.mrf.mxu0 }
 0x4b1   :  { %v536_v40 = vadd.f32 %v535_v39, %v152_v38 }
 0x4b2   :  { %v1206_v41 = vpop.f32.mrf.mxu0 }
 0x4b3   :  { %1332 = vtanh.f32 %v536_v40 }
 0x4c0   :  { %v1333_v42 = vpop.eup %1332 }
 0x4c1   :  { %1240 = vmatmul.mubr.f32.vlgmr.msra.gmra.mxu1 %v1333_v42  ;;  %v780_v43 = vmul.f32 %v1333_v42, %v1631_v46 }
 0x4c2   :  { %1278 = vmatpush3.msra.mxu1 %v1470_v6  ;;  %1309 = vmatprep.mubr.msk.f32.mxu1 %vm1411_vm0, %v1410_v2  ;;  %v119_v6 = vpop.permute.xlu0 %118 }
 0x4c3   :  { %792 = vadd.xlane.f32.xlu1 %v780_v43  ;;  %1279 = vmatprep.subr.mxu1 %v1410_v2 }
 0x4c4   :  { %1280 = vmatpush3.msra.mxu1 %v1472_v7  ;;  %v139_v7 = vmul.f32 %v1576_v29, %v119_v6 }
 0x4c5   :  { %1281 = vmatprep.subr.mxu1 %v1410_v2 }
 0x4c6   :  { %1282 = vmatpush3.msra.mxu1 %v1478_v9  ;;  %v153_v9 = vadd.f32 %v1581_v31, %v139_v7  ;;  %v785_v54 = vpop.xlane.xlu0 %784 }
 0x4c7   :  { %1283 = vmatprep.subr.mxu1 %v1410_v2 }
 0x4c8   :  { %1284 = vmatpush3.msra.mxu1 %v1483_v10 }
 0x4c9   :  { %1285 = vmatprep.subr.mxu1 %v1410_v2 }
 0x4ca   :  { %1286 = vmatpush3.msra.mxu1 %v1489_v11  ;;  %v789_v58 = vpop.xlane.xlu0 %788 }
 0x4cb   :  { %1287 = vmatprep.subr.mxu1 %v1410_v2 }
 0x4cc   :  { %1288 = vmatpush3.msra.mxu1 %v1495_v12 }
 0x4cd   :  { %1289 = vmatprep.subr.mxu1 %v1410_v2 }
 0x4ce   :  { %1290 = vmatpush3.msra.mxu1 %v1501_v13  ;;  %v791_v61 = vpop.xlane.xlu0 %790 }
 0x4cf   :  { %1291 = vmatprep.subr.mxu1 %v1410_v2 }
 0x4d0   :  { %1292 = vmatpush3.msra.mxu1 %v1509_v16 }
 0x4d1   :  { %1293 = vmatprep.subr.mxu1 %v1410_v2 }
 0x4d2   :  { %1294 = vmatpush3.msra.mxu1 %v1516_v18  ;;  %v1412_v18 = vmov 0  }
 0x4d3   :  { %1295 = vmatprep.subr.mxu1 %v1410_v2  ;;  %1320 = vset.pattern.permute.xlu1 %v1412_v18 }
 0x4d4   :  { %1296 = vmatpush3.msra.mxu1 %v1523_v21  ;;  %1321 = vset.pattern.permute.xlu0 %v1412_v18 }
 0x4d5   :  { %1297 = vmatprep.subr.mxu1 %v1410_v2 }
 0x4d6   :  { %1298 = vmatpush3.msra.mxu1 %v1529_v22 }
 0x4d7   :  { %1299 = vmatprep.subr.mxu1 %v1410_v2 }
 0x4d8   :  { %1300 = vmatpush3.msra.mxu1 %v1535_v24 }
 0x4d9   :  { %1301 = vmatprep.subr.mxu1 %v1410_v2 }
 0x4da   :  { %1302 = vmatpush3.msra.mxu1 %v1541_v25 }
 0x4db   :  { %1303 = vmatprep.subr.mxu1 %v1410_v2 }
 0x4dc   :  { %1304 = vmatpush3.msra.mxu1 %v1546_v26 }
 0x4dd   :  { %1305 = vmatprep.subr.mxu1 %v1410_v2 }
 0x4de   :  { %1306 = vmatpush3.msra.mxu1 %v1552_v27 }
 0x4df   :  { %1307 = vmatprep.subr.mxu1 %v1410_v2  ;;  %v126_v2 = vpop.permute.xlu1 %125 }
 0x4e0   :  { %1308 = vmatpush3.msra.mxu1 %v1558_v28  ;;  %v140_v21 = vmul.f32 %v1576_v29, %v126_v2 }
 0x4e2   :  { %v154_v22 = vadd.f32 %v1581_v31, %v140_v21 }
 0x4e3   :  { %v787_v50 = vpop.xlane.xlu1 %786 }
 0x54c   :  { %v793_v51 = vpop.xlane.xlu1 %792 }
 0x581   :  { %v609_v10 = vpop.f32.mrf.mxu1 }
 0x582   :  { %v610_v11 = vadd.f32 %v609_v10, %v153_v9 }
 0x583   :  { %v1241_v12 = vpop.f32.mrf.mxu1 }
 0x584   :  { %1334 = vtanh.f32 %v610_v11 }
 0x591   :  { %v1335_v13 = vpop.eup %1334 }
 0x592   :  { %1275 = vmatmul.mubr.f32.vlgmr.msra.gmra.mxu0 %v1335_v13  ;;  %v781_v16 = vmul.f32 %v1335_v13, %v1631_v46 }
 0x594   :  { %794 = vadd.xlane.f32.xlu0 %v781_v16 }
 0x61d   :  { %v795_v5 = vpop.xlane.xlu0 %794 }
 0x652   :  { %v683_v24 = vpop.f32.mrf.mxu0 }
 0x653   :  { %v684_v25 = vadd.f32 %v683_v24, %v154_v22 }
 0x654   :  { %v1276_v26 = vpop.f32.mrf.mxu0 }
 0x655   :  { %1336 = vtanh.f32 %v684_v25 }
 0x662   :  { %v1337_v27 = vpop.eup %1336 }
 0x663   :  { %1310 = vmatmul.mubr.f32.vlgmr.msra.gmra.mxu1 %v1337_v27  ;;  %v782_v28 = vmul.f32 %v1337_v27, %v1631_v46 }
 0x665   :  { %796 = vadd.xlane.f32.xlu1 %v782_v28 }
 0x676   :  { %807 = vperm.xlu1 %1320, %v895_v44  }
 0x6ee   :  { %v797_v52 = vpop.xlane.xlu1 %796 }
 0x6f2   :  { %v808_v53 = vpop.permute.xlu1 %807 }
 0x6f3   :  { %v810_v56 = vadd.f32 %v808_v53, %v785_v54  ;;  %v811_v57 = vadd.f32 %v808_v53, %v787_v50  ;;  %v812_v59 = vadd.f32 %v808_v53, %v789_v58  ;;  %v813_v63 = vadd.f32 %v808_v53, %v791_v61 }
 0x6f4   :  { %v814_v0 = vadd.f32 %v808_v53, %v793_v51  ;;  %v815_v8 = vadd.f32 %v808_v53, %v795_v5  ;;  %v816_v34 = vadd.f32 %v808_v53, %v797_v52 }
 0x6f5   :  { %v829_v60 = vrot.slane %v810_v56, %v828_v55  ;;  %v837_v62 = vrot.slane %v812_v59, %v828_v55  ;;  %v841_v4 = vrot.slane %v813_v63, %v828_v55 }
 0x6f6   :  { %v845_v3 = vrot.slane %v814_v0, %v828_v55  ;;  %v849_v17 = vrot.slane %v815_v8, %v828_v55  ;;  %v853_v30 = vrot.slane %v816_v34, %v828_v55 }
 0x723   :  { %v755_v45 = vpop.f32.mrf.mxu1 }
 0x724   :  { %v756_v47 = vadd.f32 %v1581_v31, %v755_v45  ;;  %v833_v31 = vrot.slane %v811_v57, %v828_v55 }
 0x725   :  { %v1311_v48 = vpop.f32.mrf.mxu1 }
 0x726   :  { %1338 = vtanh.f32 %v756_v47 }
 0x733   :  { %v1339_v49 = vpop.eup %1338 }
 0x734   :  { %v783_v29 = vmul.f32 %v1339_v49, %v1631_v46  ;;  %v859_v46 = vsel %vm858_vm2, %v833_v31, %v829_v60 }
 0x735   :  { %v861_v1 = vsel %vm860_vm3, %v837_v62, %v859_v46 }
 0x736   :  { %798 = vadd.xlane.f32.xlu0 %v783_v29  ;;  %v863_v14 = vsel %vm862_vm4, %v841_v4, %v861_v1 }
 0x737   :  { %v865_v15 = vsel %vm864_vm5, %v845_v3, %v863_v14 }
 0x738   :  { %v867_v23 = vsel %vm866_vm6, %v849_v17, %v865_v15 }
 0x739   :  { %v869_v33 = vsel %vm868_vm7, %v853_v30, %v867_v23 }
 0x7bf   :  { %v799_v19 = vpop.xlane.xlu0 %798 }
 0x7c0   :  { %v817_v20 = vadd.f32 %v808_v53, %v799_v19 }
 0x7c2   :  { %v857_v32 = vrot.slane %v817_v20, %v828_v55 }
 0x7c4   :  { %v871_v35 = vsel %vm870_vm8, %v857_v32, %v869_v33 }
 0x7c5   :  { %874 = vst.msk [vmem:[#allocation9] sm:$0xff] %vm873_vm9, %v871_v35 }
 0x7c6   :  { %1391 = shalt.err (!%p1388_p0)
}
 0x7c7   :  { %884 = dma.vmem_to_hbm [thread:$0]  %s882_s12, 128, %s1839_s6, [#allocation6]  }
 0x7c8   :  { %1404 = dma.done.wait [#allocation6], 128  }
 0x7c9   :  { %1405 = vsyncadd [#allocation6], 4294967168 }
 0x7ca   :  { %888 = vsyncpa [#allocation5], 1 }
 0x7cb   :  { %889 = vsyncpa [#allocation8], 1 }
 0x7cc   :  { %890 = vsyncpa [#allocation6], 1 }

</bundles_post_ra>
